<compile_context>
chip_gen: v5e
topology: v5e:2x2
jax: 0.10.0
libtpu: 0.0.40
codegen_flags: <defaults>
</compile_context>

<pallas_src>
import math

import jax
import jax.numpy as jnp
from jax.experimental import pallas as pl
from jax.experimental.pallas import tpu as pltpu


def _round_up(a, b):
    return ((a + b - 1) // b) * b


def _cdiv(a, b):
    return (a + b - 1) // b


def _nbytes(shape, dt):
    return math.prod(shape) * jnp.dtype(dt).itemsize


# --------------------------------------------------------------------------------------
# Kernels
# --------------------------------------------------------------------------------------
def _ffn_kernel_resident(x_ref, w1_ref, b1_ref, w2_ref, b2_ref, o_ref):
    """Whole FFN for one row tile; weights are fully VMEM-resident (no reduction axis)."""
    h = jnp.dot(x_ref[...], w1_ref[...], preferred_element_type=jnp.float32)
    h = jnp.maximum(h + b1_ref[...], 0.0)
    # TODO(synk): dropout p=0 in the reference module (identity); nonzero-p training dropout
    #             would use pltpu.prng_seed / pltpu.prng_random_bits here.
    y = jnp.dot(h.astype(w2_ref.dtype), w2_ref[...], preferred_element_type=jnp.float32)
    o_ref[...] = (y + b2_ref[...]).astype(o_ref.dtype)


def _ffn_kernel_streamed(x_ref, w1_ref, b1_ref, w2_ref, b2_ref, o_ref, acc_ref):
    """One (row-tile, d_ff-tile) step; d_ff is a streamed reduction axis (grid axis 1)."""
    k = pl.program_id(1)

    h = jnp.dot(x_ref[...], w1_ref[...], preferred_element_type=jnp.float32)
    h = jnp.maximum(h + b1_ref[...], 0.0)  # ReLU is per-d_ff-column, so per-tile is exact
    partial = jnp.dot(h.astype(w2_ref.dtype), w2_ref[...],
                      preferred_element_type=jnp.float32)

    @pl.when(k == 0)
    def _():
        # Fold b2 into the first partial: no zero-fill store, no epilogue add.
        acc_ref[...] = partial + b2_ref[...]

    @pl.when(k > 0)
    def _():
        acc_ref[...] += partial

    @pl.when(k == pl.num_programs(1) - 1)
    def _():
        o_ref[...] = acc_ref[...].astype(o_ref.dtype)


# --------------------------------------------------------------------------------------
# Wrapper
# --------------------------------------------------------------------------------------
def positionwise_ffn(x, w1, b1, w2, b2, *, row_tile=None):
    """x: (batch, seq, d_model). w1: (d_model, d_ff), b1: (d_ff,), w2: (d_ff, d_model), b2: (d_model,)."""
    batch, seq, d_model = x.shape
    d_ff = w1.shape[1]
    M = batch * seq
    out_dtype = x.dtype

    # ---- Generation-aware VMEM budget (v5e/v6e: 128 MiB, v7x: 64 MiB per core). ----
    try:
        vmem_cap = int(pltpu.get_tpu_info().vmem_capacity_bytes)
    except Exception:
        vmem_cap = 64 << 20  # conservative fallback (v7x per-core size)
    budget = int(vmem_cap * 0.80)          # leave headroom for compiler-internal scratch
    vmem_cap_limit = int(vmem_cap * 0.90)  # hard ceiling for vmem_limit_bytes

    # ---- Row (M) handling: pad only to a multiple of 128; ragged tiles via cdiv grid. ----
    M_pad = _round_up(M, 128)
    x2 = x.reshape(M, d_model)
    if M_pad != M:
        x2 = jnp.pad(x2, ((0, M_pad - M), (0, 0)))  # padded rows sliced off at the end

    desired_tm = int(row_tile) if row_tile is not None else 512
    tm = max(128, (min(desired_tm, M_pad) // 128) * 128)
    if M_pad // tm < 2 and M_pad >= 256:
        # Keep >= 2 row tiles so both v7x TensorCores get work on the "parallel" axis.
        tm = _round_up(_cdiv(M_pad, 2), 128)
    grid_m = _cdiv(M_pad, tm)

    b1_2 = b1.reshape(1, d_ff)
    b2_2 = b2.reshape(1, d_model)

    weight_bytes = (_nbytes(w1.shape, w1.dtype) + _nbytes(w2.shape, w2.dtype)
                    + _nbytes(b1_2.shape, b1.dtype) + _nbytes(b2_2.shape, b2.dtype))

    # ================================ Resident fast path ================================
    def resident_footprint(tm_):
        # double-buffered x/out row tiles + fully resident weights
        return weight_bytes + 2 * (_nbytes((tm_, d_model), x.dtype)
                                   + _nbytes((tm_, d_model), out_dtype))

    tm_res = tm
    while tm_res > 128 and resident_footprint(tm_res) > budget:
        tm_res -= 128  # shrink row tile before giving up on weight residency

    if resident_footprint(tm_res) <= budget:
        tm = tm_res
        grid_m = _cdiv(M_pad, tm)
        vmem_limit = int(min(max(resident_footprint(tm) + (8 << 20), 16 << 20), vmem_cap_limit))
        cost = pl.CostEstimate(
            flops=4 * M_pad * d_model * d_ff,
            transcendentals=0,
            bytes_accessed=(_nbytes((M_pad, d_model), x.dtype)
                            + _nbytes((M_pad, d_model), out_dtype)
                            + weight_bytes),
        )
        out = pl.pallas_call(
            _ffn_kernel_resident,
            out_shape=jax.ShapeDtypeStruct((M_pad, d_model), out_dtype),
            grid_spec=pltpu.PrefetchScalarGridSpec(
                num_scalar_prefetch=0,
                grid=(grid_m,),
                in_specs=[
                    pl.BlockSpec((tm, d_model), lambda i: (i, 0)),        # x row tile
                    pl.BlockSpec((d_model, d_ff), lambda i: (0, 0)),      # W1 (resident)
                    pl.BlockSpec((1, d_ff), lambda i: (0, 0)),            # b1 (resident)
                    pl.BlockSpec((d_ff, d_model), lambda i: (0, 0)),      # W2 (resident)
                    pl.BlockSpec((1, d_model), lambda i: (0, 0)),         # b2 (resident)
                ],
                out_specs=pl.BlockSpec((tm, d_model), lambda i: (i, 0)),
            ),
            compiler_params=pltpu.CompilerParams(
                dimension_semantics=("parallel",),
                vmem_limit_bytes=vmem_limit,
            ),
            cost_estimate=cost,
        )(x2, w1, b1_2, w2, b2_2)
        return out[:M].reshape(batch, seq, d_model)

    # ================================ Streaming path ====================================
    # Weights do not fit VMEM: pad d_ff to a multiple of 512 (exact — relu(0+0)=0 through
    # zero W2 rows) and stream it as a reduction grid axis with MXU-sized tiles.
    d_ff_pad = _round_up(d_ff, 512)
    if d_ff_pad != d_ff:
        w1 = jnp.pad(w1, ((0, 0), (0, d_ff_pad - d_ff)))
        b1_2 = jnp.pad(b1_2, ((0, 0), (0, d_ff_pad - d_ff)))
        w2 = jnp.pad(w2, ((0, d_ff_pad - d_ff), (0, 0)))

    def stream_footprint(tm_, tk_):
        return (2 * (_nbytes((tm_, d_model), x.dtype)
                     + _nbytes((d_model, tk_), w1.dtype)
                     + _nbytes((1, tk_), b1.dtype)
                     + _nbytes((tk_, d_model), w2.dtype)
                     + _nbytes((1, d_model), b2.dtype)
                     + _nbytes((tm_, d_model), out_dtype))
                + _nbytes((tm_, d_model), jnp.float32))   # f32 accumulator scratch

    # Bigger tm raises flop/byte of the re-streamed weights (use up to 1024 on 128 MiB parts);
    # step down for v7x's 64 MiB rather than relying on the vmem cap.
    tm_candidates = [t for t in (1024, 768, 512, 384, 256, 128) if t <= M_pad] or [128]
    tk_candidates = [t for t in range(d_ff_pad, 0, -512) if d_ff_pad % t == 0]

    tm, tk = 128, 512
    done = False
    for tm_ in tm_candidates:
        for tk_ in tk_candidates:
            if stream_footprint(tm_, tk_) + (2 << 20) <= budget:
                tm, tk = tm_, tk_
                done = True
                break
        if done:
            break

    grid_m = _cdiv(M_pad, tm)
    n_k = d_ff_pad // tk

    vmem_limit = int(min(max(stream_footprint(tm, tk) + (8 << 20), 16 << 20), vmem_cap_limit))
    cost = pl.CostEstimate(
        flops=4 * M_pad * d_model * d_ff_pad,
        transcendentals=0,
        bytes_accessed=(_nbytes((M_pad, d_model), x.dtype)
                        + _nbytes((M_pad, d_model), out_dtype)
                        + grid_m * (_nbytes(w1.shape, w1.dtype)      # weights re-streamed
                                    + _nbytes(w2.shape, w2.dtype)    # once per row tile
                                    + _nbytes(b1_2.shape, b1.dtype))
                        + _nbytes(b2_2.shape, b2.dtype)),
    )

    out = pl.pallas_call(
        _ffn_kernel_streamed,
        out_shape=jax.ShapeDtypeStruct((M_pad, d_model), out_dtype),
        grid_spec=pltpu.PrefetchScalarGridSpec(
            num_scalar_prefetch=0,
            grid=(grid_m, n_k),                                  # rows (parallel), d_ff (reduction, last)
            in_specs=[
                pl.BlockSpec((tm, d_model), lambda i, k: (i, 0)),    # x row tile
                pl.BlockSpec((d_model, tk), lambda i, k: (0, k)),    # W1 streamed over d_ff
                pl.BlockSpec((1, tk), lambda i, k: (0, k)),          # b1 streamed over d_ff
                pl.BlockSpec((tk, d_model), lambda i, k: (k, 0)),    # W2 streamed over d_ff
                pl.BlockSpec((1, d_model), lambda i, k: (0, 0)),     # b2 (resident)
            ],
            out_specs=pl.BlockSpec((tm, d_model), lambda i, k: (i, 0)),
            scratch_shapes=[pltpu.VMEM((tm, d_model), jnp.float32)],
        ),
        compiler_params=pltpu.CompilerParams(
            dimension_semantics=("parallel", "arbitrary"),
            vmem_limit_bytes=vmem_limit,
        ),
        cost_estimate=cost,
    )(x2, w1, b1_2, w2, b2_2)

    return out[:M].reshape(batch, seq, d_model)


# --------------------------------------------------------------------------------------
if __name__ == "__main__":
    key = jax.random.PRNGKey(0)
    batch, seq, d_model, d_ff = 2, 8, 32, 64

    kx, k1, k2, k3, k4 = jax.random.split(key, 5)

    # Deterministic parameter init mirroring nn.Linear's uniform(-1/sqrt(fan_in), +1/sqrt(fan_in)).
    lim1 = 1.0 / jnp.sqrt(d_model)
    lim2 = 1.0 / jnp.sqrt(d_ff)
    w1 = jax.random.uniform(k1, (d_model, d_ff), jnp.float32, -lim1, lim1)
    b1 = jax.random.uniform(k2, (d_ff,), jnp.float32, -lim1, lim1)
    w2 = jax.random.uniform(k3, (d_ff, d_model), jnp.float32, -lim2, lim2)
    b2 = jax.random.uniform(k4, (d_model,), jnp.float32, -lim2, lim2)

    x = jax.random.normal(kx, (batch, seq, d_model), jnp.float32)

    y = positionwise_ffn(x, w1, b1, w2, b2)
    y = jax.block_until_ready(y)

    # Pure-JAX reference check (dropout p=0 is the identity).
    ref = jnp.maximum(x @ w1 + b1, 0.0) @ w2 + b2
    assert y.shape == (batch, seq, d_model)
    assert jnp.allclose(y, ref, atol=1e-5, rtol=1e-5)

    print("KERNEL_OK")
</pallas_src>

<mosaic_0001>
module attributes {stable_mosaic.version = 11 : i64} {
  func.func @_ffn_kernel_resident(%arg0: i32, %arg1: memref<128x32xf32, #tpu.memory_space<vmem>>, %arg2: memref<32x64xf32, #tpu.memory_space<vmem>>, %arg3: memref<1x64xf32, #tpu.memory_space<vmem>>, %arg4: memref<64x32xf32, #tpu.memory_space<vmem>>, %arg5: memref<1x32xf32, #tpu.memory_space<vmem>>, %arg6: memref<128x32xf32, #tpu.memory_space<vmem>>) attributes {dimension_semantics = [#tpu.dimension_semantics<parallel>], iteration_bounds = array<i64: 1>, scalar_prefetch = 0 : i64, scratch_operands = 0 : i64, tpu.core_type = #tpu.core_type<tc>, window_params = [{transform_indices = @transform_0, window_bounds = array<i64: 128, 32>}, {pipeline_mode = #tpu.pipeline_mode<synchronous>, transform_indices = @transform_1, window_bounds = array<i64: 32, 64>}, {pipeline_mode = #tpu.pipeline_mode<synchronous>, transform_indices = @transform_2, window_bounds = array<i64: 1, 64>}, {pipeline_mode = #tpu.pipeline_mode<synchronous>, transform_indices = @transform_3, window_bounds = array<i64: 64, 32>}, {pipeline_mode = #tpu.pipeline_mode<synchronous>, transform_indices = @transform_4, window_bounds = array<i64: 1, 32>}, {transform_indices = @transform_5, window_bounds = array<i64: 128, 32>}]} {
    %c0 = arith.constant 0 : index
    %c0_0 = arith.constant 0 : index
    %0 = vector.load %arg1[%c0, %c0_0] : memref<128x32xf32, #tpu.memory_space<vmem>>, vector<128x32xf32>
    %c0_1 = arith.constant 0 : index
    %c0_2 = arith.constant 0 : index
    %1 = vector.load %arg2[%c0_1, %c0_2] : memref<32x64xf32, #tpu.memory_space<vmem>>, vector<32x64xf32>
    %cst = arith.constant dense<0.000000e+00> : vector<128x64xf32>
    %2 = tpu.matmul %0, %1, %cst {dimension_numbers = #tpu.dot_dimension_numbers<[1], [0], [0], [1], [0, 0, 1, 1], [], []>} : vector<128x32xf32>, vector<32x64xf32>, vector<128x64xf32> -> vector<128x64xf32>
    %c0_3 = arith.constant 0 : index
    %c0_4 = arith.constant 0 : index
    %3 = vector.load %arg3[%c0_3, %c0_4] : memref<1x64xf32, #tpu.memory_space<vmem>>, vector<1x64xf32>
    %4 = vector.broadcast %3 : vector<1x64xf32> to vector<128x64xf32>
    %5 = arith.addf %2, %4 : vector<128x64xf32>
    %cst_5 = arith.constant 0.000000e+00 : f32
    %6 = vector.broadcast %cst_5 : f32 to vector<128x64xf32>
    %7 = arith.maximumf %5, %6 : vector<128x64xf32>
    %c0_6 = arith.constant 0 : index
    %c0_7 = arith.constant 0 : index
    %8 = vector.load %arg4[%c0_6, %c0_7] : memref<64x32xf32, #tpu.memory_space<vmem>>, vector<64x32xf32>
    %cst_8 = arith.constant dense<0.000000e+00> : vector<128x32xf32>
    %9 = tpu.matmul %7, %8, %cst_8 {dimension_numbers = #tpu.dot_dimension_numbers<[1], [0], [0], [1], [0, 0, 1, 1], [], []>} : vector<128x64xf32>, vector<64x32xf32>, vector<128x32xf32> -> vector<128x32xf32>
    %c0_9 = arith.constant 0 : index
    %c0_10 = arith.constant 0 : index
    %10 = vector.load %arg5[%c0_9, %c0_10] : memref<1x32xf32, #tpu.memory_space<vmem>>, vector<1x32xf32>
    %11 = vector.broadcast %10 : vector<1x32xf32> to vector<128x32xf32>
    %12 = arith.addf %9, %11 : vector<128x32xf32>
    %c0_11 = arith.constant 0 : index
    %c0_12 = arith.constant 0 : index
    %13 = vector.load %arg6[%c0_11, %c0_12] : memref<128x32xf32, #tpu.memory_space<vmem>>, vector<128x32xf32>
    tpu.vector_store %arg6[%c0_11, %c0_12], %12 {strides = array<i32>} : memref<128x32xf32, #tpu.memory_space<vmem>>, vector<128x32xf32>,
    return
  }
  func.func @transform_0(%arg0: i32) -> (i32, i32) {
    %c0_i32 = arith.constant 0 : i32
    %c0_i32_0 = arith.constant 0 : i32
    return %arg0, %c0_i32 : i32, i32
  }
  func.func @transform_1(%arg0: i32) -> (i32, i32) {
    %c0_i32 = arith.constant 0 : i32
    %c0_i32_0 = arith.constant 0 : i32
    %c0_i32_1 = arith.constant 0 : i32
    return %c0_i32, %c0_i32_0 : i32, i32
  }
  func.func @transform_2(%arg0: i32) -> (i32, i32) {
    %c0_i32 = arith.constant 0 : i32
    %c0_i32_0 = arith.constant 0 : i32
    %c0_i32_1 = arith.constant 0 : i32
    return %c0_i32, %c0_i32_0 : i32, i32
  }
  func.func @transform_3(%arg0: i32) -> (i32, i32) {
    %c0_i32 = arith.constant 0 : i32
    %c0_i32_0 = arith.constant 0 : i32
    %c0_i32_1 = arith.constant 0 : i32
    return %c0_i32, %c0_i32_0 : i32, i32
  }
  func.func @transform_4(%arg0: i32) -> (i32, i32) {
    %c0_i32 = arith.constant 0 : i32
    %c0_i32_0 = arith.constant 0 : i32
    %c0_i32_1 = arith.constant 0 : i32
    return %c0_i32, %c0_i32_0 : i32, i32
  }
  func.func @transform_5(%arg0: i32) -> (i32, i32) {
    %c0_i32 = arith.constant 0 : i32
    %c0_i32_0 = arith.constant 0 : i32
    return %arg0, %c0_i32 : i32, i32
  }
}

</mosaic_0001>

<bundles_post_ra>
// kernel: tpu_custom_call.1
= control target key start
LH: loop header
LB: loop body
LE: loop exit
PB: predicated region body
PF: predicated region fallthrough
CT: control target
= control target key end

     0   :  { %vm44_vm0 = vcmask 261120   ;;  %vm186_vm1 = vcmask 523264   ;;  %s600_s1 = inlined_call_operand.vmem [shape: f32[32,64], index: 1, kind: input, shape index: {}]   ;;  %s601_s0 = inlined_call_operand.vmem [shape: f32[128,32], index: 0, kind: input, shape index: {}]   ;;  %s602_s2 = inlined_call_operand.vmem [shape: f32[1,64], index: 2, kind: input, shape index: {}]   ;;  %s603_s3 = inlined_call_operand.vmem [shape: f32[64,32], index: 3, kind: input, shape index: {}]   ;;  %s604_s4 = inlined_call_operand.vmem [shape: f32[1,32], index: 4, kind: input, shape index: {}]   ;;  %s605_s5 = inlined_call_operand.vmem [shape: f32[128,32], index: 5, kind: output, shape index: {}]  }
   0x1   :  { %v39_v0 = vld [vmem:[%s600_s1 + $0x18] sm:$0xff]  ;;  %v38_v1 = vld [vmem:[%s600_s1 + $0x10] sm:$0xff]  ;;  %v37_v2 = vld [vmem:[%s600_s1 + $0x8] sm:$0xff] }
   0x2   :  { %105 = vmatpush.msra.mxu0 %v39_v0  ;;  %352 = vmatpush.msra.mxu3 %v39_v0  ;;  %v36_v3 = vld [vmem:[%s600_s1] sm:$0xff]  ;;  %v21_v5 = vld [vmem:[%s601_s0 + $0x8] sm:$0xff]  ;;  %v22_v6 = vld [vmem:[%s601_s0 + $0x10] sm:$0xff] }
   0x3   :  { %v20_v4 = vld [vmem:[%s601_s0] sm:$0xff]  ;;  %v23_v7 = vld [vmem:[%s601_s0 + $0x18] sm:$0xff]  ;;  %v29_v9 = vld [vmem:[%s601_s0 + $0x48] sm:$0xff] }
   0x4   :  { %106 = vmatpush.msra.mxu0 %v38_v1  ;;  %353 = vmatpush.msra.mxu3 %v38_v1  ;;  %v24_v8 = vld [vmem:[%s601_s0 + $0x20] sm:$0xff]  ;;  %v25_v10 = vld [vmem:[%s601_s0 + $0x28] sm:$0xff]  ;;  %v30_v11 = vld [vmem:[%s601_s0 + $0x50] sm:$0xff] }
   0x5   :  { %v26_v12 = vld [vmem:[%s601_s0 + $0x30] sm:$0xff]  ;;  %v31_v13 = vld [vmem:[%s601_s0 + $0x58] sm:$0xff]  ;;  %v179_v16 = vld [vmem:[%s603_s3 + $0x28] sm:$0xff] }
   0x6   :  { %107 = vmatpush.msra.mxu0 %v37_v2  ;;  %354 = vmatpush.msra.mxu3 %v37_v2  ;;  %v181_v14 = vld [vmem:[%s603_s3 + $0x38] sm:$0xff]  ;;  %v180_v15 = vld [vmem:[%s603_s3 + $0x30] sm:$0xff]  ;;  %v178_v18 = vld [vmem:[%s603_s3 + $0x20] sm:$0xff] }
   0x7   :  { %243 = vmatpush.msra.mxu1 %v181_v14  ;;  %356 = vmatpush.msra.mxu2 %v181_v14  ;;  %v27_v17 = vld [vmem:[%s601_s0 + $0x38] sm:$0xff]  ;;  %v32_v19 = vld [vmem:[%s601_s0 + $0x60] sm:$0xff]  ;;  %v33_v22 = vld [vmem:[%s601_s0 + $0x68] sm:$0xff] }
   0x8   :  { %108 = vmatpush.msra.mxu0 %v36_v3  ;;  %355 = vmatpush.msra.mxu3 %v36_v3  ;;  %v177_v20 = vld [vmem:[%s603_s3 + $0x18] sm:$0xff]  ;;  %v28_v21 = vld [vmem:[%s601_s0 + $0x40] sm:$0xff]  ;;  %v34_v23 = vld [vmem:[%s601_s0 + $0x70] sm:$0xff] }
   0x9   :  { %320 = vmatmul.msk.f32.vlgmr.msra.gmra.mxu0 %vm44_vm0, %v20_v4  ;;  %329 = vmatmul.msk.f32.vlgmr.msra.gmra.mxu3 %vm44_vm0, %v29_v9  ;;  %v35_v24 = vld [vmem:[%s601_s0 + $0x78] sm:$0xff]  ;;  %v176_v25 = vld [vmem:[%s603_s3 + $0x10] sm:$0xff]  ;;  %v175_v26 = vld [vmem:[%s603_s3 + $0x8] sm:$0xff] }
   0xa   :  { %244 = vmatpush.msra.mxu1 %v180_v15  ;;  %357 = vmatpush.msra.mxu2 %v180_v15  ;;  %v174_v27 = vld [vmem:[%s603_s3] sm:$0xff] }
   0xb   :  { %v499_v28 = vld [vmem:[%s602_s2] ss:$0 sm:$0xff] }
   0xc   :  { %245 = vmatpush.msra.mxu1 %v179_v16  ;;  %358 = vmatpush.msra.mxu2 %v179_v16 }
   0xe   :  { %246 = vmatpush.msra.mxu1 %v178_v18  ;;  %359 = vmatpush.msra.mxu2 %v178_v18 }
  0x10   :  { %247 = vmatpush.msra.mxu1 %v177_v20  ;;  %360 = vmatpush.msra.mxu2 %v177_v20 }
  0x11   :  { %321 = vmatmul.msk.f32.gmra.mxu0 %vm44_vm0, %v21_v5  ;;  %330 = vmatmul.msk.f32.gmra.mxu3 %vm44_vm0, %v30_v11 }
  0x12   :  { %248 = vmatpush.msra.mxu1 %v176_v25  ;;  %361 = vmatpush.msra.mxu2 %v176_v25 }
  0x14   :  { %249 = vmatpush.msra.mxu1 %v175_v26  ;;  %362 = vmatpush.msra.mxu2 %v175_v26 }
  0x16   :  { %250 = vmatpush.msra.mxu1 %v174_v27  ;;  %363 = vmatpush.msra.mxu2 %v174_v27 }
  0x19   :  { %322 = vmatmul.msk.f32.gmra.mxu0 %vm44_vm0, %v22_v6  ;;  %331 = vmatmul.msk.f32.gmra.mxu3 %vm44_vm0, %v31_v13  ;;  %v365_v13 = vld [vmem:[%s604_s4] ss:$0 sm:$0xff] }
  0x21   :  { %323 = vmatmul.msk.f32.gmra.mxu0 %vm44_vm0, %v23_v7  ;;  %332 = vmatmul.msk.f32.gmra.mxu3 %vm44_vm0, %v32_v19 }
  0x29   :  { %324 = vmatmul.msk.f32.gmra.mxu0 %vm44_vm0, %v24_v8  ;;  %333 = vmatmul.msk.f32.gmra.mxu3 %vm44_vm0, %v33_v22 }
  0x31   :  { %325 = vmatmul.msk.f32.gmra.mxu0 %vm44_vm0, %v25_v10  ;;  %334 = vmatmul.msk.f32.gmra.mxu3 %vm44_vm0, %v34_v23 }
  0x39   :  { %326 = vmatmul.msk.f32.gmra.mxu0 %vm44_vm0, %v26_v12  ;;  %335 = vmatmul.msk.f32.gmra.mxu3 %vm44_vm0, %v35_v24 }
  0x41   :  { %327 = vmatmul.msk.f32.gmra.mxu0 %vm44_vm0, %v27_v17 }
  0x49   :  { %328 = vmatmul.msk.f32.gmra.mxu0 %vm44_vm0, %v28_v21 }
  0x86   :  { %v110_v29 = vpop.f32.mrf.mxu0 }
  0x87   :  { %v111_v30 = vadd.f32 %v499_v28, %v110_v29 }
  0x89   :  { %v158_v31 = vmax.f32 %v111_v30, 0.0 }
  0x8b   :  { %336 = vmatmul.msk.f32.vlgmr.msra.gmra.mxu1 %vm186_vm1, %v158_v31 }
  0x8c   :  { %v137_v50 = vpop.f32.mrf.mxu3 }
  0x8d   :  { %v138_v58 = vadd.f32 %v499_v28, %v137_v50 }
  0x8e   :  { %v113_v32 = vpop.f32.mrf.mxu0 }
  0x8f   :  { %v114_v33 = vadd.f32 %v499_v28, %v113_v32  ;;  %v167_v59 = vmax.f32 %v138_v58, 0.0 }
  0x91   :  { %v159_v34 = vmax.f32 %v114_v33, 0.0 }
  0x93   :  { %337 = vmatmul.msk.f32.gmra.mxu1 %vm186_vm1, %v159_v34 }
  0x94   :  { %v140_v55 = vpop.f32.mrf.mxu3 }
  0x95   :  { %v141_v61 = vadd.f32 %v499_v28, %v140_v55 }
  0x96   :  { %v116_v35 = vpop.f32.mrf.mxu0 }
  0x97   :  { %v117_v36 = vadd.f32 %v499_v28, %v116_v35  ;;  %v168_v62 = vmax.f32 %v141_v61, 0.0 }
  0x99   :  { %v160_v37 = vmax.f32 %v117_v36, 0.0 }
  0x9b   :  { %338 = vmatmul.msk.f32.gmra.mxu1 %vm186_vm1, %v160_v37 }
  0x9c   :  { %v143_v60 = vpop.f32.mrf.mxu3 }
  0x9d   :  { %v144_v0 = vadd.f32 %v499_v28, %v143_v60 }
  0x9e   :  { %v119_v38 = vpop.f32.mrf.mxu0 }
  0x9f   :  { %v120_v39 = vadd.f32 %v499_v28, %v119_v38  ;;  %v169_v1 = vmax.f32 %v144_v0, 0.0 }
  0xa1   :  { %v161_v40 = vmax.f32 %v120_v39, 0.0 }
  0xa3   :  { %339 = vmatmul.msk.f32.gmra.mxu1 %vm186_vm1, %v161_v40 }
  0xa4   :  { %v146_v63 = vpop.f32.mrf.mxu3 }
  0xa5   :  { %v147_v2 = vadd.f32 %v499_v28, %v146_v63 }
  0xa6   :  { %v122_v41 = vpop.f32.mrf.mxu0 }
  0xa7   :  { %v123_v42 = vadd.f32 %v499_v28, %v122_v41  ;;  %v170_v4 = vmax.f32 %v147_v2, 0.0 }
  0xa9   :  { %v162_v43 = vmax.f32 %v123_v42, 0.0 }
  0xab   :  { %340 = vmatmul.msk.f32.gmra.mxu1 %vm186_vm1, %v162_v43 }
  0xac   :  { %v149_v3 = vpop.f32.mrf.mxu3 }
  0xad   :  { %v150_v5 = vadd.f32 %v499_v28, %v149_v3 }
  0xae   :  { %v125_v44 = vpop.f32.mrf.mxu0 }
  0xaf   :  { %v126_v45 = vadd.f32 %v499_v28, %v125_v44  ;;  %v171_v7 = vmax.f32 %v150_v5, 0.0 }
  0xb1   :  { %v163_v46 = vmax.f32 %v126_v45, 0.0 }
  0xb3   :  { %341 = vmatmul.msk.f32.gmra.mxu1 %vm186_vm1, %v163_v46 }
  0xb4   :  { %v152_v6 = vpop.f32.mrf.mxu3 }
  0xb5   :  { %v153_v8 = vadd.f32 %v499_v28, %v152_v6 }
  0xb6   :  { %v128_v47 = vpop.f32.mrf.mxu0 }
  0xb7   :  { %v129_v48 = vadd.f32 %v499_v28, %v128_v47  ;;  %v172_v9 = vmax.f32 %v153_v8, 0.0 }
  0xb9   :  { %v164_v49 = vmax.f32 %v129_v48, 0.0 }
  0xbb   :  { %342 = vmatmul.msk.f32.gmra.mxu1 %vm186_vm1, %v164_v49 }
  0xbc   :  { %v155_v10 = vpop.f32.mrf.mxu3 }
  0xbd   :  { %v156_v11 = vadd.f32 %v499_v28, %v155_v10 }
  0xbe   :  { %v131_v51 = vpop.f32.mrf.mxu0 }
  0xbf   :  { %v132_v52 = vadd.f32 %v499_v28, %v131_v51  ;;  %v173_v12 = vmax.f32 %v156_v11, 0.0 }
  0xc1   :  { %v165_v53 = vmax.f32 %v132_v52, 0.0 }
  0xc3   :  { %343 = vmatmul.msk.f32.gmra.mxu1 %vm186_vm1, %v165_v53 }
  0xc6   :  { %v134_v54 = vpop.f32.mrf.mxu0 }
  0xc7   :  { %v135_v56 = vadd.f32 %v499_v28, %v134_v54 }
  0xc9   :  { %v166_v57 = vmax.f32 %v135_v56, 0.0 }
  0xcb   :  { %344 = vmatmul.msk.f32.vlgmr.msra.gmra.mxu2 %vm186_vm1, %v166_v57 }
  0xd3   :  { %345 = vmatmul.msk.f32.gmra.mxu2 %vm186_vm1, %v167_v59 }
  0xdb   :  { %346 = vmatmul.msk.f32.gmra.mxu2 %vm186_vm1, %v168_v62 }
  0xe3   :  { %347 = vmatmul.msk.f32.gmra.mxu2 %vm186_vm1, %v169_v1 }
  0xeb   :  { %348 = vmatmul.msk.f32.gmra.mxu2 %vm186_vm1, %v170_v4 }
  0xf3   :  { %349 = vmatmul.msk.f32.gmra.mxu2 %vm186_vm1, %v171_v7 }
  0xfb   :  { %350 = vmatmul.msk.f32.gmra.mxu2 %vm186_vm1, %v172_v9 }
 0x103   :  { %351 = vmatmul.msk.f32.gmra.mxu2 %vm186_vm1, %v173_v12 }
 0x108   :  { %v252_v14 = vpop.f32.mrf.mxu1 }
 0x109   :  { %v253_v15 = vadd.f32 %v365_v13, %v252_v14 }
 0x10b   :  { %300 = vst.msk [vmem:[%s605_s5] sm:$0xff] %vm44_vm0, %v253_v15 }
 0x110   :  { %v255_v16 = vpop.f32.mrf.mxu1 }
 0x111   :  { %v256_v17 = vadd.f32 %v365_v13, %v255_v16 }
 0x113   :  { %301 = vst.msk [vmem:[%s605_s5 + $0x8] sm:$0xff] %vm44_vm0, %v256_v17 }
 0x118   :  { %v258_v18 = vpop.f32.mrf.mxu1 }
 0x119   :  { %v259_v19 = vadd.f32 %v365_v13, %v258_v18 }
 0x11b   :  { %302 = vst.msk [vmem:[%s605_s5 + $0x10] sm:$0xff] %vm44_vm0, %v259_v19 }
 0x120   :  { %v261_v20 = vpop.f32.mrf.mxu1 }
 0x121   :  { %v262_v21 = vadd.f32 %v365_v13, %v261_v20 }
 0x123   :  { %303 = vst.msk [vmem:[%s605_s5 + $0x18] sm:$0xff] %vm44_vm0, %v262_v21 }
 0x128   :  { %v264_v22 = vpop.f32.mrf.mxu1 }
 0x129   :  { %v265_v23 = vadd.f32 %v365_v13, %v264_v22 }
 0x12b   :  { %304 = vst.msk [vmem:[%s605_s5 + $0x20] sm:$0xff] %vm44_vm0, %v265_v23 }
 0x130   :  { %v267_v24 = vpop.f32.mrf.mxu1 }
 0x131   :  { %v268_v25 = vadd.f32 %v365_v13, %v267_v24 }
 0x133   :  { %305 = vst.msk [vmem:[%s605_s5 + $0x28] sm:$0xff] %vm44_vm0, %v268_v25 }
 0x138   :  { %v270_v26 = vpop.f32.mrf.mxu1 }
 0x139   :  { %v271_v27 = vadd.f32 %v365_v13, %v270_v26 }
 0x13b   :  { %306 = vst.msk [vmem:[%s605_s5 + $0x30] sm:$0xff] %vm44_vm0, %v271_v27 }
 0x140   :  { %v273_v28 = vpop.f32.mrf.mxu1 }
 0x141   :  { %v274_v29 = vadd.f32 %v365_v13, %v273_v28 }
 0x143   :  { %307 = vst.msk [vmem:[%s605_s5 + $0x38] sm:$0xff] %vm44_vm0, %v274_v29 }
 0x14e   :  { %v276_v30 = vpop.f32.mrf.mxu2 }
 0x14f   :  { %v277_v31 = vadd.f32 %v365_v13, %v276_v30 }
 0x151   :  { %308 = vst.msk [vmem:[%s605_s5 + $0x40] sm:$0xff] %vm44_vm0, %v277_v31 }
 0x156   :  { %v279_v32 = vpop.f32.mrf.mxu2 }
 0x157   :  { %v280_v33 = vadd.f32 %v365_v13, %v279_v32 }
 0x159   :  { %309 = vst.msk [vmem:[%s605_s5 + $0x48] sm:$0xff] %vm44_vm0, %v280_v33 }
 0x15e   :  { %v282_v34 = vpop.f32.mrf.mxu2 }
 0x15f   :  { %v283_v35 = vadd.f32 %v365_v13, %v282_v34 }
 0x161   :  { %310 = vst.msk [vmem:[%s605_s5 + $0x50] sm:$0xff] %vm44_vm0, %v283_v35 }
 0x166   :  { %v285_v36 = vpop.f32.mrf.mxu2 }
 0x167   :  { %v286_v37 = vadd.f32 %v365_v13, %v285_v36 }
 0x169   :  { %311 = vst.msk [vmem:[%s605_s5 + $0x58] sm:$0xff] %vm44_vm0, %v286_v37 }
 0x16e   :  { %v288_v38 = vpop.f32.mrf.mxu2 }
 0x16f   :  { %v289_v39 = vadd.f32 %v365_v13, %v288_v38 }
 0x171   :  { %312 = vst.msk [vmem:[%s605_s5 + $0x60] sm:$0xff] %vm44_vm0, %v289_v39 }
 0x176   :  { %v291_v40 = vpop.f32.mrf.mxu2 }
 0x177   :  { %v292_v41 = vadd.f32 %v365_v13, %v291_v40 }
 0x179   :  { %313 = vst.msk [vmem:[%s605_s5 + $0x68] sm:$0xff] %vm44_vm0, %v292_v41 }
 0x17e   :  { %v294_v42 = vpop.f32.mrf.mxu2 }
 0x17f   :  { %v295_v43 = vadd.f32 %v365_v13, %v294_v42 }
 0x181   :  { %314 = vst.msk [vmem:[%s605_s5 + $0x70] sm:$0xff] %vm44_vm0, %v295_v43 }
 0x186   :  { %v297_v44 = vpop.f32.mrf.mxu2 }
 0x187   :  { %v298_v45 = vadd.f32 %v365_v13, %v297_v44 }
 0x189   :  { %315 = vst.msk [vmem:[%s605_s5 + $0x78] sm:$0xff] %vm44_vm0, %v298_v45 }

</bundles_post_ra>
